<compile_context>
chip_gen: v7x
topology: tpu7x:2x2x1
jax: 0.10.0
libtpu: 0.0.40
codegen_flags: <defaults>
</compile_context>

<pallas_src>
import jax
import jax.numpy as jnp
from jax import lax
from jax.experimental import pallas as pl
from jax.experimental.pallas import tpu as pltpu


def _round_up(x: int, m: int) -> int:
    return ((x + m - 1) // m) * m


def _pad_rows(x, rows):
    r = x.shape[0]
    if r == rows:
        return x
    return jnp.pad(x, ((0, rows - r), (0, 0)))


# ---------------------------------------------------------------------------
# Kernel 1: item-side multimodal fusion (hoisted out of the rec-score loop).
#   enhanced_item = item_emb + t_feat @ W_t + v_feat @ W_v   (bf16 MXU, f32 acc)
# All inputs arrive in f32 (read exactly once) and are cast in-register.
# ---------------------------------------------------------------------------
def _item_fusion_kernel(item_ref, t_ref, v_ref, wt_ref, wv_ref, out_ref):
    bf16 = jnp.bfloat16
    fused = item_ref[...]
    fused = fused + jnp.dot(
        t_ref[...].astype(bf16), wt_ref[...].astype(bf16),
        preferred_element_type=jnp.float32)
    fused = fused + jnp.dot(
        v_ref[...].astype(bf16), wv_ref[...].astype(bf16),
        preferred_element_type=jnp.float32)
    out_ref[...] = fused


# ---------------------------------------------------------------------------
# Kernel 2: recommendation scores — streaming bf16 MXU matmul, no transpose.
# Item tile is resident over the inner user axis; contraction on dim 1 of both.
# ---------------------------------------------------------------------------
def _rec_score_kernel(item_ref, user_ref, rec_ref):
    scores = lax.dot_general(
        user_ref[...].astype(jnp.bfloat16),
        item_ref[...].astype(jnp.bfloat16),
        dimension_numbers=(((1,), (1,)), ((), ())),
        preferred_element_type=jnp.float32,
    )
    rec_ref[...] = scores.astype(rec_ref.dtype)


# ---------------------------------------------------------------------------
# Kernel 3: preference head  Linear(D, D//2) -> ReLU -> Linear(D//2, 1).
# Output is the transposed lane-dense form (8, TU) with only row 0 real,
# avoiding the 128x write amplification of a (TU, 128) padded slab.
# Dropout is identity at inference.
# ---------------------------------------------------------------------------
def _pref_head_kernel(user_ref, w1_ref, b1_ref, w2t_ref, b2_ref, pref_ref):
    bf16 = jnp.bfloat16
    h = jnp.dot(user_ref[...].astype(bf16), w1_ref[...].astype(bf16),
                preferred_element_type=jnp.float32)
    h = jnp.maximum(h + b1_ref[...], 0.0).astype(bf16)
    pref_ref[...] = lax.dot_general(
        w2t_ref[...].astype(bf16), h,
        dimension_numbers=(((1,), (1,)), ((), ())),
        preferred_element_type=jnp.float32,
    ) + b2_ref[...]


def mig_dpg_forward(user_emb, item_emb, item_t_feat, item_v_feat, params,
                    *, tile_u=512, tile_i=2048, scores_dtype=jnp.float32):
    """Fused forward pass (recommendation mode); returns a dict mimicking the
    torch module's outputs. Dropout is identity at inference."""
    U, D = user_emb.shape
    I = item_emb.shape[0]
    Dt = item_t_feat.shape[1]
    Dv = item_v_feat.shape[1]
    Dh = params["W1"].shape[1]
    f32 = jnp.float32
    out_itemsize = jnp.dtype(scores_dtype).itemsize

    # --- tile geometry: prefer exact (unpadded) extents so no pad/slice pass --
    if U <= tile_u:
        TU, U_pad = U, U
    else:
        TU = tile_u                       # multiple of 16 -> clean bf16 packing
        U_pad = _round_up(U, TU)
    if I <= tile_i:
        TI, I_pad = I, I
    else:
        TI = tile_i
        I_pad = _round_up(I, TI)
    grid_u = U_pad // TU
    grid_i = I_pad // TI

    # --- operand prep (all f32; zero row-padding only when strictly needed) --
    user_p = _pad_rows(user_emb.astype(f32), U_pad)
    item_p = _pad_rows(item_emb.astype(f32), I_pad)
    t_p = _pad_rows(item_t_feat.astype(f32), I_pad)
    v_p = _pad_rows(item_v_feat.astype(f32), I_pad)
    w_t = params["W_t"].astype(f32)
    w_v = params["W_v"].astype(f32)
    w1 = params["W1"].astype(f32)
    b1 = params["b1"].reshape(1, Dh).astype(f32)
    w2t = jnp.zeros((8, Dh), f32).at[0].set(params["W2"].reshape(Dh).astype(f32))
    b2 = params["b2"].reshape(1, 1).astype(f32)

    # --- kernel 1: item fusion (grid over item tiles) ------------------------
    item_enh = pl.pallas_call(
        _item_fusion_kernel,
        grid=(grid_i,),
        in_specs=[
            pl.BlockSpec((TI, D), lambda i: (i, 0)),
            pl.BlockSpec((TI, Dt), lambda i: (i, 0)),
            pl.BlockSpec((TI, Dv), lambda i: (i, 0)),
            pl.BlockSpec((Dt, D), lambda i: (0, 0)),   # resident weights
            pl.BlockSpec((Dv, D), lambda i: (0, 0)),
        ],
        out_specs=pl.BlockSpec((TI, D), lambda i: (i, 0)),
        out_shape=jax.ShapeDtypeStruct((I_pad, D), f32),
        compiler_params=pltpu.CompilerParams(dimension_semantics=("parallel",)),
    )(item_p, t_p, v_p, w_t, w_v)

    # --- kernel 2: recommendation scores (item tiles outer, user tiles inner) -
    vmem_est = 2 * (TU * D * 4 + TI * D * 4 + TU * TI * out_itemsize) + (1 << 20)
    vmem_limit = int(min(64 * 1024 * 1024, max(32 * 1024 * 1024, vmem_est)))
    rec_cost = pl.CostEstimate(
        flops=2 * U_pad * I_pad * D,
        transcendentals=0,
        bytes_accessed=(I_pad * D * 4                 # item table streamed once
                        + grid_i * U_pad * D * 4      # user table re-streamed
                        + U_pad * I_pad * out_itemsize),
    )
    rec_p = pl.pallas_call(
        _rec_score_kernel,
        grid=(grid_i, grid_u),
        in_specs=[
            pl.BlockSpec((TI, D), lambda i, u: (i, 0)),  # resident over inner u
            pl.BlockSpec((TU, D), lambda i, u: (u, 0)),
        ],
        out_specs=pl.BlockSpec((TU, TI), lambda i, u: (u, i)),
        out_shape=jax.ShapeDtypeStruct((U_pad, I_pad), scores_dtype),
        compiler_params=pltpu.CompilerParams(
            dimension_semantics=("parallel", "parallel"),
            vmem_limit_bytes=vmem_limit),
        cost_estimate=rec_cost,
    )(item_enh, user_p)

    # --- kernel 3: preference head (user tiles only, lane-dense transposed) --
    pref_rows = pl.pallas_call(
        _pref_head_kernel,
        grid=(grid_u,),
        in_specs=[
            pl.BlockSpec((TU, D), lambda u: (u, 0)),
            pl.BlockSpec((D, Dh), lambda u: (0, 0)),
            pl.BlockSpec((1, Dh), lambda u: (0, 0)),
            pl.BlockSpec((8, Dh), lambda u: (0, 0)),
            pl.BlockSpec((1, 1), lambda u: (0, 0)),
        ],
        out_specs=pl.BlockSpec((8, TU), lambda u: (0, u)),
        out_shape=jax.ShapeDtypeStruct((8, U_pad), f32),
        compiler_params=pltpu.CompilerParams(dimension_semantics=("parallel",)),
    )(user_p, w1, b1, w2t, b2)

    item_embeddings = item_enh if I_pad == I else item_enh[:I]
    rec_scores = rec_p if (U_pad == U and I_pad == I) else rec_p[:U, :I]
    preference_scores = pref_rows[0, :U].reshape(U, 1)

    return {
        "user_embeddings": user_emb,          # enhanced_user == user (passthrough)
        "item_embeddings": item_embeddings,
        "recommendation_scores": rec_scores,
        "preference_scores": preference_scores,
    }


def init_params(key, embedding_size, text_feat_size, vision_feat_size):
    D = embedding_size
    Dh = D // 2
    k = jax.random.split(key, 6)
    scale = 0.05
    return {
        "W_t": scale * jax.random.normal(k[0], (text_feat_size, D), jnp.float32),
        "W_v": scale * jax.random.normal(k[1], (vision_feat_size, D), jnp.float32),
        "W1": scale * jax.random.normal(k[2], (D, Dh), jnp.float32),
        "b1": jnp.zeros((1, Dh), jnp.float32),
        "W2": scale * jax.random.normal(k[3], (Dh, 1), jnp.float32),
        "b2": jnp.zeros((1, 1), jnp.float32),
    }


if __name__ == "__main__":
    # Small config consistent with the module's __init__:
    #   embedding_size=32, num_users=8, num_items=16,
    #   text_feat_size=64, vision_feat_size=48
    num_users = 8
    num_items = 16
    embedding_size = 32
    text_feat_size = 64
    vision_feat_size = 48

    key = jax.random.PRNGKey(0)
    k_user, k_item, k_t, k_v, k_param = jax.random.split(key, 5)

    user_embeddings = jax.random.normal(k_user, (num_users, embedding_size), jnp.float32)
    item_embeddings = jax.random.normal(k_item, (num_items, embedding_size), jnp.float32)
    item_t_feat = jax.random.normal(k_t, (num_items, text_feat_size), jnp.float32)
    item_v_feat = jax.random.normal(k_v, (num_items, vision_feat_size), jnp.float32)

    params = init_params(k_param, embedding_size, text_feat_size, vision_feat_size)

    outputs = mig_dpg_forward(
        user_embeddings, item_embeddings, item_t_feat, item_v_feat, params
    )
    jax.block_until_ready(outputs)

    # ---- reference with matched bf16-operand / f32-accumulate precision ----
    bf16, f32 = jnp.bfloat16, jnp.float32
    ref_item = (
        item_embeddings
        + jnp.dot(item_t_feat.astype(bf16), params["W_t"].astype(bf16),
                  preferred_element_type=f32)
        + jnp.dot(item_v_feat.astype(bf16), params["W_v"].astype(bf16),
                  preferred_element_type=f32)
    )
    ref_rec = lax.dot_general(
        user_embeddings.astype(bf16),
        ref_item.astype(bf16),
        dimension_numbers=(((1,), (1,)), ((), ())),
        preferred_element_type=f32,
    )
    h_ref = jnp.maximum(
        jnp.dot(user_embeddings.astype(bf16), params["W1"].astype(bf16),
                preferred_element_type=f32) + params["b1"], 0.0
    ).astype(bf16)
    ref_pref = jnp.dot(h_ref, params["W2"].astype(bf16),
                       preferred_element_type=f32) + params["b2"]

    assert outputs["user_embeddings"].shape == (num_users, embedding_size)
    assert outputs["recommendation_scores"].shape == (num_users, num_items)
    assert outputs["preference_scores"].shape == (num_users, 1)
    assert jnp.allclose(outputs["item_embeddings"], ref_item, atol=1e-2, rtol=1e-2), \
        "item embedding mismatch"
    assert jnp.allclose(outputs["recommendation_scores"], ref_rec, atol=1e-2, rtol=1e-2), \
        "recommendation score mismatch"
    assert jnp.allclose(outputs["preference_scores"], ref_pref, atol=1e-2, rtol=1e-2), \
        "preference score mismatch"

    print("KERNEL_OK")
</pallas_src>

<mosaic_0001>
module attributes {stable_mosaic.version = 11 : i64} {
  func.func @_item_fusion_kernel(%arg0: i32, %arg1: memref<16x32xf32, #tpu.memory_space<vmem>>, %arg2: memref<16x64xf32, #tpu.memory_space<vmem>>, %arg3: memref<16x48xf32, #tpu.memory_space<vmem>>, %arg4: memref<64x32xf32, #tpu.memory_space<vmem>>, %arg5: memref<48x32xf32, #tpu.memory_space<vmem>>, %arg6: memref<16x32xf32, #tpu.memory_space<vmem>>) attributes {dimension_semantics = [#tpu.dimension_semantics<parallel>], iteration_bounds = array<i64: 1>, scalar_prefetch = 0 : i64, scratch_operands = 0 : i64, tpu.core_type = #tpu.core_type<tc>, window_params = [{transform_indices = @transform_0, window_bounds = array<i64: 16, 32>}, {transform_indices = @transform_1, window_bounds = array<i64: 16, 64>}, {transform_indices = @transform_2, window_bounds = array<i64: 16, 48>}, {pipeline_mode = #tpu.pipeline_mode<synchronous>, transform_indices = @transform_3, window_bounds = array<i64: 64, 32>}, {pipeline_mode = #tpu.pipeline_mode<synchronous>, transform_indices = @transform_4, window_bounds = array<i64: 48, 32>}, {transform_indices = @transform_5, window_bounds = array<i64: 16, 32>}]} {
    %c0 = arith.constant 0 : index
    %c0_0 = arith.constant 0 : index
    %0 = vector.load %arg1[%c0, %c0_0] : memref<16x32xf32, #tpu.memory_space<vmem>>, vector<16x32xf32>
    %c0_1 = arith.constant 0 : index
    %c0_2 = arith.constant 0 : index
    %1 = vector.load %arg2[%c0_1, %c0_2] : memref<16x64xf32, #tpu.memory_space<vmem>>, vector<16x64xf32>
    %2 = arith.truncf %1 : vector<16x64xf32> to vector<16x64xbf16>
    %c0_3 = arith.constant 0 : index
    %c0_4 = arith.constant 0 : index
    %3 = vector.load %arg4[%c0_3, %c0_4] : memref<64x32xf32, #tpu.memory_space<vmem>>, vector<64x32xf32>
    %4 = arith.truncf %3 : vector<64x32xf32> to vector<64x32xbf16>
    %cst = arith.constant dense<0.000000e+00> : vector<16x32xf32>
    %5 = tpu.matmul %2, %4, %cst {dimension_numbers = #tpu.dot_dimension_numbers<[1], [0], [0], [1], [0, 0, 1, 1], [], []>} : vector<16x64xbf16>, vector<64x32xbf16>, vector<16x32xf32> -> vector<16x32xf32>
    %6 = arith.addf %0, %5 : vector<16x32xf32>
    %c0_5 = arith.constant 0 : index
    %c0_6 = arith.constant 0 : index
    %7 = vector.load %arg3[%c0_5, %c0_6] : memref<16x48xf32, #tpu.memory_space<vmem>>, vector<16x48xf32>
    %8 = arith.truncf %7 : vector<16x48xf32> to vector<16x48xbf16>
    %c0_7 = arith.constant 0 : index
    %c0_8 = arith.constant 0 : index
    %9 = vector.load %arg5[%c0_7, %c0_8] : memref<48x32xf32, #tpu.memory_space<vmem>>, vector<48x32xf32>
    %10 = arith.truncf %9 : vector<48x32xf32> to vector<48x32xbf16>
    %cst_9 = arith.constant dense<0.000000e+00> : vector<16x32xf32>
    %11 = tpu.matmul %8, %10, %cst_9 {dimension_numbers = #tpu.dot_dimension_numbers<[1], [0], [0], [1], [0, 0, 1, 1], [], []>} : vector<16x48xbf16>, vector<48x32xbf16>, vector<16x32xf32> -> vector<16x32xf32>
    %12 = arith.addf %6, %11 : vector<16x32xf32>
    %c0_10 = arith.constant 0 : index
    %c0_11 = arith.constant 0 : index
    %13 = vector.load %arg6[%c0_10, %c0_11] : memref<16x32xf32, #tpu.memory_space<vmem>>, vector<16x32xf32>
    tpu.vector_store %arg6[%c0_10, %c0_11], %12 {strides = array<i32>} : memref<16x32xf32, #tpu.memory_space<vmem>>, vector<16x32xf32>,
    return
  }
  func.func @transform_0(%arg0: i32) -> (i32, i32) {
    %c0_i32 = arith.constant 0 : i32
    %c0_i32_0 = arith.constant 0 : i32
    return %arg0, %c0_i32 : i32, i32
  }
  func.func @transform_1(%arg0: i32) -> (i32, i32) {
    %c0_i32 = arith.constant 0 : i32
    %c0_i32_0 = arith.constant 0 : i32
    return %arg0, %c0_i32 : i32, i32
  }
  func.func @transform_2(%arg0: i32) -> (i32, i32) {
    %c0_i32 = arith.constant 0 : i32
    %c0_i32_0 = arith.constant 0 : i32
    return %arg0, %c0_i32 : i32, i32
  }
  func.func @transform_3(%arg0: i32) -> (i32, i32) {
    %c0_i32 = arith.constant 0 : i32
    %c0_i32_0 = arith.constant 0 : i32
    %c0_i32_1 = arith.constant 0 : i32
    return %c0_i32, %c0_i32_0 : i32, i32
  }
  func.func @transform_4(%arg0: i32) -> (i32, i32) {
    %c0_i32 = arith.constant 0 : i32
    %c0_i32_0 = arith.constant 0 : i32
    %c0_i32_1 = arith.constant 0 : i32
    return %c0_i32, %c0_i32_0 : i32, i32
  }
  func.func @transform_5(%arg0: i32) -> (i32, i32) {
    %c0_i32 = arith.constant 0 : i32
    %c0_i32_0 = arith.constant 0 : i32
    return %arg0, %c0_i32 : i32, i32
  }
}

</mosaic_0001>

<bundles_post_ra>
// kernel: tpu_custom_call.1
= control target key start
LH: loop header
LB: loop body
LE: loop exit
PB: predicated region body
PF: predicated region fallthrough
CT: control target
= control target key end

     0   :  { %v230_v3 = vmov 0.0   ;;  %vm231_vm0 = vmmov 0   ;;  %s337_s0 = inlined_call_operand.vmem [shape: f32[16,32], index: 0, kind: input, shape index: {}]   ;;  %s338_s1 = inlined_call_operand.vmem [shape: f32[16,64], index: 1, kind: input, shape index: {}]   ;;  %s339_s2 = inlined_call_operand.vmem [shape: f32[16,48], index: 2, kind: input, shape index: {}]   ;;  %s340_s3 = inlined_call_operand.vmem [shape: f32[64,32], index: 3, kind: input, shape index: {}]   ;;  %s341_s4 = inlined_call_operand.vmem [shape: f32[48,32], index: 4, kind: input, shape index: {}]   ;;  %s342_s5 = inlined_call_operand.hbm [shape: f32[16,32], index: 5, kind: output, shape index: {}]  }
   0x1   :  { %v27_v0 = vld [vmem:[%s340_s3] sm:$0xff]  ;;  %v28_v1 = vld [vmem:[%s340_s3 + $0x8] sm:$0xff]  ;;  %175 = vmatprep.subr.bf16.mxu1 %v230_v3  ;;  %187 = vmatprep.subr.bf16.mxu0 %v230_v3  ;;  %v29_v6 = vld [vmem:[%s340_s3 + $0x10] sm:$0xff] }
   0x2   :  { %v89_v2 = vld [vmem:[%s341_s4] sm:$0xff]  ;;  %v35_v4 = vpack.c.bf16 %v28_v1, %v27_v0  ;;  %v90_v5 = vld [vmem:[%s341_s4 + $0x8] sm:$0xff]  ;;  %v30_v7 = vld [vmem:[%s340_s3 + $0x18] sm:$0xff]  ;;  %193 = vmatprep.mubr.msk.bf16.mxu0 %vm231_vm0, %v230_v3  ;;  %183 = vmatprep.mubr.msk.bf16.mxu1 %vm231_vm0, %v230_v3 }
   0x3   :  { %v95_v8 = vpack.c.bf16 %v90_v5, %v89_v2  ;;  %v91_v9 = vld [vmem:[%s341_s4 + $0x10] sm:$0xff]  ;;  %v92_v10 = vld [vmem:[%s341_s4 + $0x18] sm:$0xff]  ;;  %v36_v11 = vpack.c.bf16 %v30_v7, %v29_v6  ;;  %v31_v13 = vld [vmem:[%s340_s3 + $0x20] sm:$0xff] }
   0x4   :  { %176 = vmatpush3.bf16.msra.mxu1 %v35_v4  ;;  %v96_v12 = vpack.c.bf16 %v92_v10, %v91_v9  ;;  %v32_v14 = vld [vmem:[%s340_s3 + $0x28] sm:$0xff]  ;;  %v93_v15 = vld [vmem:[%s341_s4 + $0x20] sm:$0xff] }
   0x5   :  { %177 = vmatprep.subr.bf16.mxu1 %v230_v3  ;;  %188 = vmatpush3.bf16.msra.mxu0 %v95_v8  ;;  %v94_v16 = vld [vmem:[%s341_s4 + $0x28] sm:$0xff] }
   0x6   :  { %189 = vmatprep.subr.bf16.mxu0 %v230_v3 }
   0x7   :  { %10 = vsyncpa [#allocation3], 0  ;;  %v37_v17 = vpack.c.bf16 %v32_v14, %v31_v13  ;;  %v33_v18 = vld [vmem:[%s340_s3 + $0x30] sm:$0xff]  ;;  %v97_v19 = vpack.c.bf16 %v94_v16, %v93_v15  ;;  %v34_v20 = vld [vmem:[%s340_s3 + $0x38] sm:$0xff]  ;;  %vm98_vm1 = vcmask 392192   ;;  %vm39_vm2 = vcmask 523264  }
   0x8   :  { %178 = vmatpush3.bf16.msra.mxu1 %v36_v11  ;;  %v86_v21 = vld [vmem:[%s339_s2] sm:$0xff]  ;;  %v87_v22 = vld [vmem:[%s339_s2 + $0x8] sm:$0xff]  ;;  %v38_v23 = vpack.c.bf16 %v34_v20, %v33_v18  ;;  %vm145_vm3 = vcmask 261120  }
   0x9   :  { %179 = vmatprep.subr.bf16.mxu1 %v230_v3  ;;  %190 = vmatpush3.bf16.msra.mxu0 %v96_v12  ;;  %v88_v24 = vpack.c.bf16 %v87_v22, %v86_v21  ;;  %v24_v25 = vld [vmem:[%s338_s1] sm:$0xff]  ;;  %v25_v26 = vld [vmem:[%s338_s1 + $0x8] sm:$0xff]  ;;  %s232_s1 = smov [#allocation2]  }
   0xa   :  { %191 = vmatprep.subr.bf16.mxu0 %v230_v3  ;;  %v26_v27 = vpack.c.bf16 %v25_v26, %v24_v25  ;;  %v22_v29 = vld [vmem:[%s337_s0] sm:$0xff]  ;;  %v23_v33 = vld [vmem:[%s337_s0 + $0x8] sm:$0xff]  ;;  %s153_s30 = sshll.u32 %s232_s1, 4  ;;  %s154_s30 = int_to_ptr.vmem [resolvable:$true] %s153_s30 }
   0xb   :  { %s206_s6 = scalar_lea.vmem %s154_s30, 256  ;;  %p211_p1 = scmp.lt.s32.totalorder %s154_s30, %s154_s30 }
   0xc   :  { %180 = vmatpush3.bf16.msra.mxu1 %v37_v17  ;;  %p207_p0 = scmp.ne.s32.totalorder %s154_s30, %s206_s6  ;;  %p212_p2 = scmp.lt.s32.totalorder %s206_s6, %s206_s6 }
   0xd   :  { %181 = vmatprep.subr.bf16.mxu1 %v230_v3  ;;  %192 = vmatpush3.bf16.msra.mxu0 %v97_v19 }
   0xe   :  { %p213_p3 = por %p212_p2, %p211_p1 }
  0x10   :  { %182 = vmatpush3.bf16.msra.mxu1 %v38_v23  ;;  %194 = vmatmul.mubr.msk.bf16.vlgmr.msra.gmra.mrb[0].mxu0 %vm98_vm1, %v88_v24  ;;  %p214_p4 = pnand %p213_p3, %p207_p0 }
  0x13   :  { %184 = vmatmul.mubr.msk.bf16.vlgmr.msra.gmra.mrb[0].mxu1 %vm39_vm2, %v26_v27 }
  0xe3   :  { %v136_v28 = vpop.f32.mrb[0].mxu0 }
  0xe4   :  { %v195_v30 = vpop.f32.mrb[1].mxu0 }
  0xe5   :  { %v139_v31 = vpop.f32.mrb[2].mxu0 }
  0xe6   :  { %v77_v32 = vpop.f32.mrb[0].mxu1  ;;  %v196_v34 = vpop.f32.mrb[3].mxu0 }
  0xe7   :  { %v84_v35 = vadd.f32 %v77_v32, %v22_v29  ;;  %v185_v36 = vpop.f32.mrb[1].mxu1 }
  0xe8   :  { %v80_v37 = vpop.f32.mrb[2].mxu1 }
  0xe9   :  { %v143_v38 = vadd.f32 %v136_v28, %v84_v35  ;;  %v85_v39 = vadd.f32 %v80_v37, %v23_v33  ;;  %v186_v40 = vpop.f32.mrb[3].mxu1 }
  0xeb   :  { %146 = vst.msk [vmem:[#allocation2] sm:$0xff] %vm145_vm3, %v143_v38  ;;  %v144_v41 = vadd.f32 %v139_v31, %v85_v39 }
  0xed   :  { %147 = vst.msk [vmem:[#allocation2 + $0x8] sm:$0xff] %vm145_vm3, %v144_v41 }
  0xee   :  { %217 = shalt.err (!%p214_p4)
}
  0xef   :  { %s218_s8 = scalar_lea.hbm %s342_s5, 256 }
  0xf0   :  { %p219_p5 = scmp.ne.s32.totalorder %s342_s5, %s218_s8  ;;  %p222_p6 = scmp.lt.u32.totalorder %s218_s8, %s342_s5 }
  0xf2   :  { %p224_p7 = pnand %p222_p6, %p219_p5 }
  0xf4   :  { %227 = shalt.err (!%p224_p7)
}
  0xf5   :  { %s233_s13 = smov 128   ;;  %s234_s14 = smov 8  }
  0xf6   :  { %159 = dma.vmem_to_hbm [thread:$0]  %s154_s30, 256, %s342_s5, [#allocation3], %s233_s13, %s233_s13, %s234_s14  }
  0xf7   :  { %228 = dma.done.wait [#allocation3], 256  }
  0xf8   :  { %229 = vsyncadd [#allocation3], 4294967040 }
  0xf9   :  { %163 = vsyncpa [#allocation3], 1 }

</bundles_post_ra>
